<compile_context>
chip_gen: v6e
topology: v6e:2x2x1
jax: 0.10.0
libtpu: 0.0.40
codegen_flags: <defaults>
</compile_context>

<pallas_src>
import jax
import jax.numpy as jnp
from jax.experimental import pallas as pl
from jax.experimental.pallas import tpu as pltpu


def alm_len_from_nsides(nsides: int) -> int:
    # healpy convention: lmax = 3*nside - 1, alm length = (lmax+1)(lmax+2)/2
    lmax = 3 * nsides - 1
    return (lmax + 1) * (lmax + 2) // 2


def _upgrade_kernel(x_ref, o_ref):
    # x_ref : (rows_tile, N_small) VMEM
    # o_ref : (rows_tile, N_large) VMEM
    n_small = x_ref.shape[-1]
    n_large = o_ref.shape[-1]
    # Two disjoint stores: head copy + tail zeros. Exactly N_large lanes of
    # stores per row (vs N_large + N_small for zero-then-overwrite).
    o_ref[:, pl.ds(0, n_small)] = x_ref[...]
    o_ref[:, pl.ds(n_small, n_large - n_small)] = jnp.zeros(
        (o_ref.shape[0], n_large - n_small), dtype=o_ref.dtype
    )


def _pick_rows_tile(n_rows: int, n_small: int, n_large: int, itemsize: int) -> int:
    # Double-buffered input + output tiles must stay well under the scoped
    # VMEM limit; tightest budget is v7x (64 MiB physical / 32 MiB scoped).
    budget_bytes = 16 * 1024 * 1024
    per_row = 2 * (n_small + n_large) * itemsize  # x2 = double buffering
    max_rows = max(8, (budget_bytes // per_row) // 8 * 8)
    if n_rows <= max_rows:
        # Single block: block dims equal the full array dims, so the (8,128)
        # divisibility constraint does not apply.
        return n_rows
    # Multiple of 8 (sublane packing); cap so per-step overhead stays amortized
    # while keeping enough grid steps for megacore sharding.
    return int(min(max_rows, 1024))


class Upgrade:
    """JAX/Pallas equivalent of the PyTorch Upgrade module (no parameters)."""

    def __init__(self, nsides: int, upgrade_factor: int):
        new_nsides = nsides * upgrade_factor
        self.N_small = alm_len_from_nsides(nsides)
        self.N_large = alm_len_from_nsides(new_nsides)

    def __call__(self, x: jax.Array, rows_tile=None) -> jax.Array:
        B, C, n_small = x.shape
        assert n_small == self.N_small, (
            f"expected last dim {self.N_small}, got {n_small}"
        )
        n_large = self.N_large
        n_rows = B * C

        # Flatten (B, C) onto the sublane/row axis for dense (8,128) packing.
        # Free in XLA: (B, C, N) is row-major contiguous.
        x2 = x.reshape(n_rows, n_small)

        if rows_tile is None:
            rows_tile = _pick_rows_tile(n_rows, n_small, n_large, x.dtype.itemsize)

        num_tiles = pl.cdiv(n_rows, rows_tile)
        padded_rows = num_tiles * rows_tile
        if padded_rows != n_rows:
            # Pad rows so every grid step sees a full block.
            x2 = jnp.pad(x2, ((0, padded_rows - n_rows), (0, 0)))

        out2 = pl.pallas_call(
            _upgrade_kernel,
            out_shape=jax.ShapeDtypeStruct((padded_rows, n_large), x.dtype),
            grid=(num_tiles,),
            in_specs=[pl.BlockSpec((rows_tile, n_small), lambda i: (i, 0))],
            out_specs=pl.BlockSpec((rows_tile, n_large), lambda i: (i, 0)),
            compiler_params=pltpu.CompilerParams(
                # Independent row tiles -> shard across both v7x TensorCores;
                # harmless on single-TC v5e/v6e.
                dimension_semantics=("parallel",),
                vmem_limit_bytes=32 * 1024 * 1024,
            ),
        )(x2)

        if padded_rows != n_rows:
            out2 = out2[:n_rows]
        return out2.reshape(B, C, n_large)
        # TODO(synk): for very large upgrade_factor (N_large >> N_small), add a
        # lane-axis grid so pure-zero tail blocks skip the input DMA entirely.


def _ref_pad(x: jax.Array, n_large: int) -> jax.Array:
    B, C, n_small = x.shape
    return jnp.zeros((B, C, n_large), dtype=x.dtype).at[..., :n_small].set(x)


if __name__ == "__main__":
    key = jax.random.PRNGKey(0)

    # --- Case 1: base example, single block -------------------------------
    nsides, upgrade_factor = 4, 2
    B, C = 2, 4
    module = Upgrade(nsides, upgrade_factor)
    n_small, n_large = module.N_small, module.N_large  # 78 -> 300

    k1, k2 = jax.random.split(key)
    x = jax.random.normal(k1, (B, C, n_small), dtype=jnp.float32)
    out = jax.block_until_ready(module(x))
    ref = _ref_pad(x, n_large)
    assert out.shape == (B, C, n_large)
    assert out.dtype == x.dtype
    assert bool(jnp.allclose(out, ref)), "case 1: mismatch vs reference zero-pad"

    # --- Case 2: exercise the row grid (multiple tiles + padded tail) -----
    B2, C2 = 5, 8  # 40 rows, rows_tile=16 -> grid of 3 with padded tail
    x2 = jax.random.normal(k2, (B2, C2, n_small), dtype=jnp.float32)
    out2 = jax.block_until_ready(module(x2, rows_tile=16))
    ref2 = _ref_pad(x2, n_large)
    assert out2.shape == (B2, C2, n_large)
    assert bool(jnp.allclose(out2, ref2)), "case 2: mismatch vs reference zero-pad"

    print("KERNEL_OK")
</pallas_src>

<mosaic_0001>
module attributes {stable_mosaic.version = 11 : i64} {
  func.func @_upgrade_kernel(%arg0: i32, %arg1: memref<8x78xf32, #tpu.memory_space<vmem>>, %arg2: memref<8x300xf32, #tpu.memory_space<vmem>>) attributes {dimension_semantics = [#tpu.dimension_semantics<parallel>], iteration_bounds = array<i64: 1>, scalar_prefetch = 0 : i64, scratch_operands = 0 : i64, tpu.core_type = #tpu.core_type<tc>, window_params = [{transform_indices = @transform_0, window_bounds = array<i64: 8, 78>}, {transform_indices = @transform_1, window_bounds = array<i64: 8, 300>}]} {
    %c0 = arith.constant 0 : index
    %c0_0 = arith.constant 0 : index
    %0 = vector.load %arg1[%c0, %c0_0] : memref<8x78xf32, #tpu.memory_space<vmem>>, vector<8x78xf32>
    %c0_1 = arith.constant 0 : index
    %c0_2 = arith.constant 0 : index
    %1 = vector.load %arg2[%c0_1, %c0_2] : memref<8x300xf32, #tpu.memory_space<vmem>>, vector<8x78xf32>
    tpu.vector_store %arg2[%c0_1, %c0_2], %0 {strides = array<i32>} : memref<8x300xf32, #tpu.memory_space<vmem>>, vector<8x78xf32>,
    %cst = arith.constant 0.000000e+00 : f32
    %2 = vector.broadcast %cst : f32 to vector<8x222xf32>
    %c0_3 = arith.constant 0 : index
    %c78 = arith.constant 78 : index
    %3 = vector.load %arg2[%c0_3, %c78] : memref<8x300xf32, #tpu.memory_space<vmem>>, vector<8x222xf32>
    tpu.vector_store %arg2[%c0_3, %c78], %2 {strides = array<i32>} : memref<8x300xf32, #tpu.memory_space<vmem>>, vector<8x222xf32>,
    return
  }
  func.func @transform_0(%arg0: i32) -> (i32, i32) {
    %c0_i32 = arith.constant 0 : i32
    %c0_i32_0 = arith.constant 0 : i32
    return %arg0, %c0_i32 : i32, i32
  }
  func.func @transform_1(%arg0: i32) -> (i32, i32) {
    %c0_i32 = arith.constant 0 : i32
    %c0_i32_0 = arith.constant 0 : i32
    return %arg0, %c0_i32 : i32, i32
  }
}

</mosaic_0001>

<bundles_post_ra>
// kernel: tpu_custom_call.1
= control target key start
LH: loop header
LB: loop body
LE: loop exit
PB: predicated region body
PF: predicated region fallthrough
CT: control target
= control target key end

     0   :  { %6 = vsyncpa [#allocation3], 0  ;;  %s110_s0 = inlined_call_operand.hbm [shape: f32[8,78], index: 0, kind: input, shape index: {}]   ;;  %s111_s1 = inlined_call_operand.hbm [shape: f32[8,300], index: 1, kind: output, shape index: {}]  }
   0x1   :  { %7 = vsyncpa [#allocation4], 0  ;;  %s91_s6 = smov [#allocation2]  }
   0x2   :  { %s14_s7 = sshll.u32 %s91_s6, 4  ;;  %s15_s7 = int_to_ptr.vmem [resolvable:$true] %s14_s7 }
   0x3   :  { %s55_s8 = scalar_lea.vmem %s15_s7, 128  ;;  %p60_p1 = scmp.lt.s32.totalorder %s15_s7, %s15_s7 }
   0x4   :  { %p56_p0 = scmp.ne.s32.totalorder %s15_s7, %s55_s8  ;;  %p61_p2 = scmp.lt.s32.totalorder %s55_s8, %s55_s8 }
   0x6   :  { %p62_p3 = por %p61_p2, %p60_p1 }
   0x8   :  { %p63_p4 = pnand %p62_p3, %p56_p0 }
   0xa   :  { %66 = shalt.err (!%p63_p4)
}
   0xb   :  { %17 = dma.hbm_to_vmem [thread:$0]  %s110_s0, 128, %s15_s7, [#allocation3]  }
   0xc   :  { %87 = dma.done.wait [#allocation3], 128  }
   0xd   :  { %88 = vsyncadd [#allocation3], 4294967168  ;;  %vm27_vm0 = vcmask 359424   ;;  %v92_v0 = vmov 0.0   ;;  %s93_s11 = smov [#allocation5]   ;;  %vm22_vm1 = vcmask 637952  }
   0xe   :  { %26 = vst [vmem:[#allocation5 + $0x8] sm:$0xff] %v92_v0  ;;  %28 = vst.msk [vmem:[#allocation5 + $0x10] sm:$0xff] %vm27_vm0, %v92_v0  ;;  %s35_s12 = sshll.u32 %s93_s11, 4  ;;  %vm24_vm2 = vcmask 1048176   ;;  %v21_v1 = vld [vmem:[#allocation2] sm:$0xff]  ;;  %s36_s12 = int_to_ptr.vmem [resolvable:$true] %s35_s12 }
   0xf   :  { %23 = vst.msk [vmem:[#allocation5] sm:$0xff] %vm22_vm1, %v21_v1  ;;  %s67_s13 = scalar_lea.vmem %s36_s12, 384  ;;  %p72_p6 = scmp.lt.s32.totalorder %s36_s12, %s36_s12 }
  0x10   :  { %25 = vst.msk [vmem:[#allocation5] sm:$0xff] %vm24_vm2, %v92_v0  ;;  %p68_p5 = scmp.ne.s32.totalorder %s36_s12, %s67_s13  ;;  %p73_p7 = scmp.lt.s32.totalorder %s67_s13, %s67_s13 }
  0x12   :  { %p74_p8 = por %p73_p7, %p72_p6 }
  0x14   :  { %p75_p9 = pnand %p74_p8, %p68_p5 }
  0x16   :  { %78 = shalt.err (!%p75_p9)
}
  0x17   :  { %38 = dma.vmem_to_hbm [thread:$0]  %s36_s12, 384, %s111_s1, [#allocation4]  }
  0x18   :  { %89 = dma.done.wait [#allocation4], 384  }
  0x19   :  { %90 = vsyncadd [#allocation4], 4294966912 }
  0x1a   :  { %42 = vsyncpa [#allocation3], 1 }
  0x1b   :  { %43 = vsyncpa [#allocation4], 1 }

</bundles_post_ra>
